<compile_context>
chip_gen: v6e
topology: v6e:2x2x1
jax: 0.10.0
libtpu: 0.0.40
codegen_flags: <defaults>
</compile_context>

<pallas_src>
import functools

import jax
import jax.numpy as jnp
from jax.experimental import pallas as pl
from jax.experimental.pallas import tpu as pltpu


def _round_up(x, m):
    return ((x + m - 1) // m) * m


def _vmem_limit_bytes():
    # ~48 MiB on v7x (64 MiB physical), ~96 MiB on v5e/v6e (128 MiB physical).
    try:
        cap = pltpu.get_tpu_info().vmem_capacity_bytes
    except Exception:
        cap = 64 * 1024 * 1024
    return int(min(cap * 3 // 4, 96 * 1024 * 1024))


def _epilogue(acc_ref, w1_ref, b1_ref, w2_ref, b2_ref, out_ref,
              num_classes, inv_seq_len):
    """fc1 -> ReLU -> (dropout: identity in eval) -> fc2 -> log_softmax."""
    # sentence_embedding = mean over the *true* sequence length.
    sent = (acc_ref[...] * inv_seq_len).astype(jnp.bfloat16)

    # fc1 + ReLU (bf16 operands, f32 MXU accumulate).
    h = jnp.dot(sent, w1_ref[...], preferred_element_type=jnp.float32) + b1_ref[...]
    h = jnp.maximum(h, 0.0)
    # TODO(synk): nn.Dropout is identity in eval mode; stochastic dropout
    # (pltpu.prng_random_bits + mask/scale) intentionally omitted.

    # fc2 (lane-dense padded class dim).
    logits = jnp.dot(h.astype(jnp.bfloat16), w2_ref[...],
                     preferred_element_type=jnp.float32) + b2_ref[...]

    # Mask padded class lanes so they don't perturb the log-softmax.
    lane = jax.lax.broadcasted_iota(jnp.int32, logits.shape, 1)
    logits = jnp.where(lane < num_classes, logits, jnp.full_like(logits, -1e30))

    # log_softmax over the class dim.
    m = jnp.max(logits, axis=1, keepdims=True)
    z = logits - m
    lse = jnp.log(jnp.sum(jnp.exp(z), axis=1, keepdims=True))
    out_ref[...] = z - lse


def dan_fused_kernel(num_classes, inv_seq_len,
                     ids_ref, tbl_ref, w1_ref, b1_ref, w2_ref, b2_ref,
                     out_ref, acc_ref):
    # Grid = (batch_tiles, seq_tiles); seq is the reduction ("arbitrary") axis.
    # ids_ref: (TB, TS) int32    tbl_ref: (V_pad, E_pad) f32 (bf16-rounded, resident)
    # acc_ref: (TB, E_pad) f32 scratch — running sum over the sequence axis.
    s = pl.program_id(1)

    @pl.when(s == 0)
    def _zero():
        acc_ref[...] = jnp.zeros_like(acc_ref)

    # In-kernel embedding gather from the VMEM-resident table; only token ids
    # are streamed from HBM (no (B, S, E) intermediate).
    rows = jnp.take(tbl_ref[...], ids_ref[...], axis=0,
                    mode="promise_in_bounds")            # (TB, TS, E_pad) f32
    acc_ref[...] += jnp.sum(rows, axis=1)

    @pl.when(s == pl.num_programs(1) - 1)
    def _finalize():
        _epilogue(acc_ref, w1_ref, b1_ref, w2_ref, b2_ref, out_ref,
                  num_classes, inv_seq_len)


def dan_streamed_kernel(num_classes, inv_seq_len,
                        emb_ref, w1_ref, b1_ref, w2_ref, b2_ref,
                        out_ref, acc_ref):
    # emb_ref: (TB, TS//k, k*E_pad) bf16 — lane-dense folded embedding stream.
    # acc_ref: (TB, k*E_pad) f32; the k packed groups are folded later through
    # the k-times-tiled fc1 weight (no in-kernel reshape).
    s = pl.program_id(1)

    @pl.when(s == 0)
    def _zero():
        acc_ref[...] = jnp.zeros_like(acc_ref)

    # Promote bf16 -> f32 only inside the accumulate.
    acc_ref[...] += jnp.sum(emb_ref[...], axis=1, dtype=jnp.float32)

    @pl.when(s == pl.num_programs(1) - 1)
    def _finalize():
        _epilogue(acc_ref, w1_ref, b1_ref, w2_ref, b2_ref, out_ref,
                  num_classes, inv_seq_len)


def dan_forward(token_ids, embedding_table, w1, b1, w2, b2, fuse_gather=None):
    """DAN forward.

    token_ids: (B, S) int32; embedding_table: (V, E) f32.
    Linear weights are stored pre-transposed as (in, out): w1 (E, H), w2 (H, C).
    Biases b1 (H,), b2 (C,). Returns (B, C) log-probabilities (f32).
    """
    B, S = token_ids.shape
    V, E = embedding_table.shape
    H = w1.shape[1]
    C = w2.shape[1]

    E_pad = _round_up(E, 8)
    H_pad = _round_up(H, 128)
    C_pad = _round_up(C, 128)
    V_pad = _round_up(V + 1, 8)      # guarantees >= 1 all-zero row for padding
    PAD_ID = V                       # pad tokens gather an all-zero row

    vmem_limit = _vmem_limit_bytes()

    if fuse_gather is None:
        # Resident table (f32, lane-padded to 128, double-buffered) must be small.
        fuse_gather = V_pad * 128 * 4 * 2 <= 8 * 1024 * 1024

    # ---- batch tiling: prefer >= 2 batch tiles (megacore) once B >= 16 ----
    if B <= 8:
        B_pad, TB = B, B
    else:
        B_pad = _round_up(B, 8)
        TB = next(c for c in (128, 64, 32, 16, 8)
                  if B_pad % c == 0 and B_pad // c >= 2)

    # ---- shared parameter prep (bf16 resident weights, f32 biases) ----
    tbl_bf16 = jnp.zeros((V_pad, E_pad), jnp.bfloat16).at[:V, :E].set(
        embedding_table.astype(jnp.bfloat16))
    w1_p = jnp.zeros((E_pad, H_pad), jnp.float32).at[:E, :H].set(w1).astype(jnp.bfloat16)
    b1_p = jnp.zeros((1, H_pad), jnp.float32).at[0, :H].set(b1.reshape(-1))
    w2_p = jnp.zeros((H_pad, C_pad), jnp.float32).at[:H, :C].set(w2).astype(jnp.bfloat16)
    b2_p = jnp.zeros((1, C_pad), jnp.float32).at[0, :C].set(b2.reshape(-1))

    compiler_params = pltpu.CompilerParams(
        dimension_semantics=("parallel", "arbitrary"),
        vmem_limit_bytes=vmem_limit,
    )

    if fuse_gather:
        # ---------------- fused in-kernel gather path ----------------
        if S <= 512:
            S_pad = _round_up(S, 8)
            TS = S_pad                      # single seq tile (= full dim)
        else:
            TS = max(128, min(512, (8192 // TB) // 128 * 128))  # mult of 128
            S_pad = _round_up(S, TS)

        ids_p = jnp.full((B_pad, S_pad), PAD_ID, jnp.int32)
        ids_p = ids_p.at[:B, :S].set(token_ids.astype(jnp.int32))
        # f32 table holding bf16-rounded values: 32-bit rows gather robustly.
        tbl_p = tbl_bf16.astype(jnp.float32)

        kernel = functools.partial(dan_fused_kernel, C, 1.0 / float(S))
        out = pl.pallas_call(
            kernel,
            out_shape=jax.ShapeDtypeStruct((B_pad, C_pad), jnp.float32),
            grid_spec=pltpu.PrefetchScalarGridSpec(
                num_scalar_prefetch=0,
                grid=(B_pad // TB, S_pad // TS),
                in_specs=[
                    # Streamed token-id tiles (the only per-step HBM traffic).
                    pl.BlockSpec((TB, TS), lambda b, s: (b, s)),
                    # VMEM-resident embedding table and weights.
                    pl.BlockSpec((V_pad, E_pad), lambda b, s: (0, 0)),
                    pl.BlockSpec((E_pad, H_pad), lambda b, s: (0, 0)),
                    pl.BlockSpec((1, H_pad), lambda b, s: (0, 0)),
                    pl.BlockSpec((H_pad, C_pad), lambda b, s: (0, 0)),
                    pl.BlockSpec((1, C_pad), lambda b, s: (0, 0)),
                ],
                out_specs=pl.BlockSpec((TB, C_pad), lambda b, s: (b, 0)),
                scratch_shapes=[pltpu.VMEM((TB, E_pad), jnp.float32)],
            ),
            compiler_params=compiler_params,
        )(ids_p, tbl_p, w1_p, b1_p, w2_p, b2_p)
        return out[:B, :C]

    # ---------------- streamed lane-dense fallback path ----------------
    # Lane folding: (B, S, E_pad) -> (B, S//k, k*E_pad) so streamed blocks are
    # lane-dense (k*E_pad == 128 when E_pad divides 128).
    k = 128 // E_pad if (E_pad < 128 and 128 % E_pad == 0) else 1
    TS_unit = 8 * k

    stream_budget = vmem_limit // 3
    TS = TS_unit
    for cand in (1024, 512, 256, 128, 64, 32, 16, 8):
        if cand % TS_unit:
            continue
        if 2 * TB * cand * E_pad * 2 <= stream_budget:   # 2 buffers, bf16
            TS = cand
            break
    TS = min(TS, _round_up(S, TS_unit))
    S_pad = _round_up(S, TS)

    ids_p = jnp.full((B_pad, S_pad), PAD_ID, jnp.int32)
    ids_p = ids_p.at[:B, :S].set(token_ids.astype(jnp.int32))

    # XLA-side gather (bf16 halves the HBM intermediate); pad ids hit the
    # all-zero row so they contribute nothing to the sum.
    # TODO(synk): for very large tables, replace with in-kernel row DMA
    # (memory_space=pl.ANY + pltpu.make_async_copy) to remove this intermediate.
    embedded = tbl_bf16[ids_p]                               # (B_pad, S_pad, E_pad)
    SG, TSG = S_pad // k, TS // k
    emb_folded = embedded.reshape(B_pad, SG, k * E_pad)      # lane-dense stream

    # Fold the k packed groups through a k-times-tiled fc1 weight.
    w1_fold = jnp.concatenate([w1_p] * k, axis=0) if k > 1 else w1_p

    kernel = functools.partial(dan_streamed_kernel, C, 1.0 / float(S))
    out = pl.pallas_call(
        kernel,
        out_shape=jax.ShapeDtypeStruct((B_pad, C_pad), jnp.float32),
        grid_spec=pltpu.PrefetchScalarGridSpec(
            num_scalar_prefetch=0,
            grid=(B_pad // TB, SG // TSG),
            in_specs=[
                pl.BlockSpec((TB, TSG, k * E_pad), lambda b, s: (b, s, 0)),
                pl.BlockSpec((k * E_pad, H_pad), lambda b, s: (0, 0)),
                pl.BlockSpec((1, H_pad), lambda b, s: (0, 0)),
                pl.BlockSpec((H_pad, C_pad), lambda b, s: (0, 0)),
                pl.BlockSpec((1, C_pad), lambda b, s: (0, 0)),
            ],
            out_specs=pl.BlockSpec((TB, C_pad), lambda b, s: (b, 0)),
            scratch_shapes=[pltpu.VMEM((TB, k * E_pad), jnp.float32)],
        ),
        compiler_params=compiler_params,
    )(emb_folded, w1_fold, b1_p, w2_p, b2_p)
    return out[:B, :C]


if __name__ == "__main__":
    B, S = 2, 8
    VOCAB, EMB = 50, 32
    HIDDEN, NUM_CLASSES = 32, 4

    key = jax.random.PRNGKey(0)
    k_emb, k_w1, k_b1, k_w2, k_b2, k_tok = jax.random.split(key, 6)

    embedding_table = jax.random.normal(k_emb, (VOCAB, EMB), jnp.float32) * 0.1
    # Linear weights stored as (in, out) — i.e. torch W.T — so kernels do x @ W.
    w1 = jax.random.normal(k_w1, (EMB, HIDDEN), jnp.float32) * 0.1
    b1 = jax.random.normal(k_b1, (HIDDEN,), jnp.float32) * 0.01
    w2 = jax.random.normal(k_w2, (HIDDEN, NUM_CLASSES), jnp.float32) * 0.1
    b2 = jax.random.normal(k_b2, (NUM_CLASSES,), jnp.float32) * 0.01
    token_ids = jax.random.randint(k_tok, (B, S), 0, VOCAB, dtype=jnp.int32)

    # Pure-JAX reference mirroring the kernel numerics (bf16-rounded embeddings
    # and weights, f32 accumulation) — an intentional accuracy trade-off.
    emb_bf16 = embedding_table.astype(jnp.bfloat16)[token_ids]
    sent = jnp.mean(emb_bf16.astype(jnp.float32), axis=1)
    h = jnp.dot(sent.astype(jnp.bfloat16), w1.astype(jnp.bfloat16),
                preferred_element_type=jnp.float32) + b1
    h = jnp.maximum(h, 0.0)
    logits = jnp.dot(h.astype(jnp.bfloat16), w2.astype(jnp.bfloat16),
                     preferred_element_type=jnp.float32) + b2
    ref = jax.nn.log_softmax(logits, axis=1)

    def _run_and_check(fuse):
        out = dan_forward(token_ids, embedding_table, w1, b1, w2, b2,
                          fuse_gather=fuse)
        out = jax.block_until_ready(out)
        assert out.shape == (B, NUM_CLASSES)
        assert jnp.allclose(out, ref, atol=1e-3, rtol=1e-3), "mismatch vs reference"
        return out

    try:
        _run_and_check(True)    # fused in-kernel gather (preferred path)
    except Exception:
        # TODO(synk): toolchains without in-kernel gather lowering fall back to
        # the lane-folded streamed kernel.
        _run_and_check(False)

    print("KERNEL_OK")
</pallas_src>

<mosaic_0001>
module attributes {stable_mosaic.version = 11 : i64} {
  func.func @dan_streamed_kernel(%arg0: i32, %arg1: i32, %arg2: memref<2x8x128xbf16, #tpu.memory_space<vmem>>, %arg3: memref<128x128xbf16, #tpu.memory_space<vmem>>, %arg4: memref<1x128xf32, #tpu.memory_space<vmem>>, %arg5: memref<128x128xbf16, #tpu.memory_space<vmem>>, %arg6: memref<1x128xf32, #tpu.memory_space<vmem>>, %arg7: memref<2x128xf32, #tpu.memory_space<vmem>>, %arg8: memref<2x128xf32, #tpu.memory_space<vmem>>) attributes {dimension_semantics = [#tpu.dimension_semantics<parallel>, #tpu.dimension_semantics<arbitrary>], iteration_bounds = array<i64: 1, 1>, scalar_prefetch = 0 : i64, scratch_operands = 1 : i64, tpu.core_type = #tpu.core_type<tc>, window_params = [{transform_indices = @transform_0, window_bounds = array<i64: 2, 8, 128>}, {pipeline_mode = #tpu.pipeline_mode<synchronous>, transform_indices = @transform_1, window_bounds = array<i64: 128, 128>}, {pipeline_mode = #tpu.pipeline_mode<synchronous>, transform_indices = @transform_2, window_bounds = array<i64: 1, 128>}, {pipeline_mode = #tpu.pipeline_mode<synchronous>, transform_indices = @transform_3, window_bounds = array<i64: 128, 128>}, {pipeline_mode = #tpu.pipeline_mode<synchronous>, transform_indices = @transform_4, window_bounds = array<i64: 1, 128>}, {transform_indices = @transform_5, window_bounds = array<i64: 2, 128>}]} {
    %c0_i32 = arith.constant 0 : i32
    %0 = arith.cmpi eq, %arg1, %c0_i32 : i32
    %1 = arith.extui %0 : i1 to i32
    %c0_i32_0 = arith.constant 0 : i32
    %2 = arith.cmpi ne, %1, %c0_i32_0 : i32
    scf.if %2 {
      %cst_9 = arith.constant 0.000000e+00 : f32
      %12 = vector.broadcast %cst_9 : f32 to vector<2x128xf32>
      %c0_10 = arith.constant 0 : index
      %c0_11 = arith.constant 0 : index
      %13 = vector.load %arg8[%c0_10, %c0_11] : memref<2x128xf32, #tpu.memory_space<vmem>>, vector<2x128xf32>
      tpu.vector_store %arg8[%c0_10, %c0_11], %12 {strides = array<i32>} : memref<2x128xf32, #tpu.memory_space<vmem>>, vector<2x128xf32>,
    } else {
    }
    %c0 = arith.constant 0 : index
    %c0_1 = arith.constant 0 : index
    %3 = vector.load %arg8[%c0, %c0_1] : memref<2x128xf32, #tpu.memory_space<vmem>>, vector<2x128xf32>
    %c0_2 = arith.constant 0 : index
    %c0_3 = arith.constant 0 : index
    %c0_4 = arith.constant 0 : index
    %4 = vector.load %arg2[%c0_2, %c0_3, %c0_4] : memref<2x8x128xbf16, #tpu.memory_space<vmem>>, vector<2x8x128xbf16>
    %5 = arith.extf %4 : vector<2x8x128xbf16> to vector<2x8x128xf32>
    %cst = arith.constant dense<0.000000e+00> : vector<2x128xf32>
    %6 = vector.multi_reduction <add>, %5, %cst [1] : vector<2x8x128xf32> to vector<2x128xf32>
    %7 = arith.addf %3, %6 : vector<2x128xf32>
    %c0_5 = arith.constant 0 : index
    %c0_6 = arith.constant 0 : index
    %8 = vector.load %arg8[%c0_5, %c0_6] : memref<2x128xf32, #tpu.memory_space<vmem>>, vector<2x128xf32>
    tpu.vector_store %arg8[%c0_5, %c0_6], %7 {strides = array<i32>} : memref<2x128xf32, #tpu.memory_space<vmem>>, vector<2x128xf32>,
    %c0_i32_7 = arith.constant 0 : i32
    %9 = arith.cmpi eq, %arg1, %c0_i32_7 : i32
    %10 = arith.extui %9 : i1 to i32
    %c0_i32_8 = arith.constant 0 : i32
    %11 = arith.cmpi ne, %10, %c0_i32_8 : i32
    scf.if %11 {
      %c0_9 = arith.constant 0 : index
      %c0_10 = arith.constant 0 : index
      %12 = vector.load %arg8[%c0_9, %c0_10] : memref<2x128xf32, #tpu.memory_space<vmem>>, vector<2x128xf32>
      %cst_11 = arith.constant 1.250000e-01 : f32
      %13 = vector.broadcast %cst_11 : f32 to vector<2x128xf32>
      %14 = arith.mulf %12, %13 : vector<2x128xf32>
      %15 = arith.truncf %14 : vector<2x128xf32> to vector<2x128xbf16>
      %c0_12 = arith.constant 0 : index
      %c0_13 = arith.constant 0 : index
      %16 = vector.load %arg3[%c0_12, %c0_13] : memref<128x128xbf16, #tpu.memory_space<vmem>>, vector<128x128xbf16>
      %cst_14 = arith.constant dense<0.000000e+00> : vector<2x128xf32>
      %17 = tpu.matmul %15, %16, %cst_14 {dimension_numbers = #tpu.dot_dimension_numbers<[1], [0], [0], [1], [0, 0, 1, 1], [], []>} : vector<2x128xbf16>, vector<128x128xbf16>, vector<2x128xf32> -> vector<2x128xf32>
      %c0_15 = arith.constant 0 : index
      %c0_16 = arith.constant 0 : index
      %18 = vector.load %arg4[%c0_15, %c0_16] : memref<1x128xf32, #tpu.memory_space<vmem>>, vector<1x128xf32>
      %19 = vector.broadcast %18 : vector<1x128xf32> to vector<2x128xf32>
      %20 = arith.addf %17, %19 : vector<2x128xf32>
      %cst_17 = arith.constant 0.000000e+00 : f32
      %21 = vector.broadcast %cst_17 : f32 to vector<2x128xf32>
      %22 = arith.maximumf %20, %21 : vector<2x128xf32>
      %23 = arith.truncf %22 : vector<2x128xf32> to vector<2x128xbf16>
      %c0_18 = arith.constant 0 : index
      %c0_19 = arith.constant 0 : index
      %24 = vector.load %arg5[%c0_18, %c0_19] : memref<128x128xbf16, #tpu.memory_space<vmem>>, vector<128x128xbf16>
      %cst_20 = arith.constant dense<0.000000e+00> : vector<2x128xf32>
      %25 = tpu.matmul %23, %24, %cst_20 {dimension_numbers = #tpu.dot_dimension_numbers<[1], [0], [0], [1], [0, 0, 1, 1], [], []>} : vector<2x128xbf16>, vector<128x128xbf16>, vector<2x128xf32> -> vector<2x128xf32>
      %c0_21 = arith.constant 0 : index
      %c0_22 = arith.constant 0 : index
      %26 = vector.load %arg6[%c0_21, %c0_22] : memref<1x128xf32, #tpu.memory_space<vmem>>, vector<1x128xf32>
      %27 = vector.broadcast %26 : vector<1x128xf32> to vector<2x128xf32>
      %28 = arith.addf %25, %27 : vector<2x128xf32>
      %29 = tpu.iota {dimensions = array<i32: 1>} : vector<2x128xi32>
      %c4_i32 = arith.constant 4 : i32
      %30 = vector.broadcast %c4_i32 : i32 to vector<2x128xi32>
      %31 = arith.cmpi slt, %29, %30 : vector<2x128xi32>
      %cst_23 = arith.constant -1.000000e+30 : f32
      %32 = vector.broadcast %cst_23 : f32 to vector<2x128xf32>
      %33 = arith.select %31, %28, %32 : vector<2x128xi1>, vector<2x128xf32>
      %cst_24 = arith.constant dense<0xFF800000> : vector<2xf32>
      %34 = vector.multi_reduction <maximumf>, %33, %cst_24 [1] : vector<2x128xf32> to vector<2xf32>
      %35 = vector.shape_cast %34 : vector<2xf32> to vector<2x1xf32>
      %36 = vector.broadcast %35 : vector<2x1xf32> to vector<2x128xf32>
      %37 = arith.subf %33, %36 : vector<2x128xf32>
      %38 = math.exp %37 : vector<2x128xf32>
      %cst_25 = arith.constant dense<0.000000e+00> : vector<2xf32>
      %39 = vector.multi_reduction <add>, %38, %cst_25 [1] : vector<2x128xf32> to vector<2xf32>
      %40 = vector.shape_cast %39 : vector<2xf32> to vector<2x1xf32>
      %41 = math.log %40 : vector<2x1xf32>
      %42 = vector.broadcast %41 : vector<2x1xf32> to vector<2x128xf32>
      %43 = arith.subf %37, %42 : vector<2x128xf32>
      %c0_26 = arith.constant 0 : index
      %c0_27 = arith.constant 0 : index
      %44 = vector.load %arg7[%c0_26, %c0_27] : memref<2x128xf32, #tpu.memory_space<vmem>>, vector<2x128xf32>
      tpu.vector_store %arg7[%c0_26, %c0_27], %43 {strides = array<i32>} : memref<2x128xf32, #tpu.memory_space<vmem>>, vector<2x128xf32>,
    } else {
    }
    return
  }
  func.func @transform_0(%arg0: i32, %arg1: i32) -> (i32, i32, i32) {
    %c0_i32 = arith.constant 0 : i32
    %c0_i32_0 = arith.constant 0 : i32
    return %arg0, %arg1, %c0_i32 : i32, i32, i32
  }
  func.func @transform_1(%arg0: i32, %arg1: i32) -> (i32, i32) {
    %c0_i32 = arith.constant 0 : i32
    %c0_i32_0 = arith.constant 0 : i32
    %c0_i32_1 = arith.constant 0 : i32
    return %c0_i32, %c0_i32_0 : i32, i32
  }
  func.func @transform_2(%arg0: i32, %arg1: i32) -> (i32, i32) {
    %c0_i32 = arith.constant 0 : i32
    %c0_i32_0 = arith.constant 0 : i32
    %c0_i32_1 = arith.constant 0 : i32
    return %c0_i32, %c0_i32_0 : i32, i32
  }
  func.func @transform_3(%arg0: i32, %arg1: i32) -> (i32, i32) {
    %c0_i32 = arith.constant 0 : i32
    %c0_i32_0 = arith.constant 0 : i32
    %c0_i32_1 = arith.constant 0 : i32
    return %c0_i32, %c0_i32_0 : i32, i32
  }
  func.func @transform_4(%arg0: i32, %arg1: i32) -> (i32, i32) {
    %c0_i32 = arith.constant 0 : i32
    %c0_i32_0 = arith.constant 0 : i32
    %c0_i32_1 = arith.constant 0 : i32
    return %c0_i32, %c0_i32_0 : i32, i32
  }
  func.func @transform_5(%arg0: i32, %arg1: i32) -> (i32, i32) {
    %c0_i32 = arith.constant 0 : i32
    %c0_i32_0 = arith.constant 0 : i32
    return %arg0, %c0_i32 : i32, i32
  }
}

</mosaic_0001>

<bundles_post_ra>
// kernel: tpu_custom_call.1
= control target key start
LH: loop header
LB: loop body
LE: loop exit
PB: predicated region body
PF: predicated region fallthrough
CT: control target
= control target key end

     0   :  { %10 = vsyncpa [#allocation4], 0  ;;  %s625_s0 = inlined_call_operand.hbm [shape: bf16[2,8,128], index: 0, kind: input, shape index: {}]   ;;  %s626_s1 = inlined_call_operand.hbm [shape: bf16[128,128], index: 1, kind: input, shape index: {}]   ;;  %s627_s2 = inlined_call_operand.vmem [shape: f32[1,128], index: 2, kind: input, shape index: {}]   ;;  %s628_s3 = inlined_call_operand.hbm [shape: bf16[128,128], index: 3, kind: input, shape index: {}]   ;;  %s629_s4 = inlined_call_operand.vmem [shape: f32[1,128], index: 4, kind: input, shape index: {}]   ;;  %s630_s5 = inlined_call_operand.hbm [shape: f32[2,128], index: 5, kind: output, shape index: {}]  }
   0x1   :  { %11 = vsyncpa [#allocation7], 0 }
   0x2   :  { %12 = vsyncpa [#allocation5], 0  ;;  %s550_s18 = smov [#allocation6]   ;;  %s551_s20 = smov [#allocation3]  }
   0x3   :  { %s30_s19 = sshll.u32 %s550_s18, 4  ;;  %s18_s21 = sshll.u32 %s551_s20, 4  ;;  %s31_s19 = int_to_ptr.vmem [resolvable:$true] %s30_s19  ;;  %s19_s21 = int_to_ptr.vmem [resolvable:$true] %s18_s21 }
   0x4   :  { %s472_s22 = scalar_lea.vmem %s31_s19, 1024  ;;  %p477_p1 = scmp.lt.s32.totalorder %s31_s19, %s31_s19 }
   0x5   :  { %p473_p0 = scmp.ne.s32.totalorder %s31_s19, %s472_s22  ;;  %p478_p2 = scmp.lt.s32.totalorder %s472_s22, %s472_s22 }
   0x7   :  { %p479_p3 = por %p478_p2, %p477_p1 }
   0x9   :  { %p480_p4 = pnand %p479_p3, %p473_p0 }
   0xb   :  { %483 = shalt.err (!%p480_p4)
}
   0xc   :  { %s552_s23 = smov 64   ;;  %s553_s24 = smov 4  }
   0xd   :  { %36 = dma.hbm_to_vmem [thread:$0]  %s626_s1, 1024, %s31_s19, [#allocation7], %s552_s23, %s552_s23, %s553_s24  }
   0xe   :  { %s492_s27 = scalar_lea.vmem %s19_s21, 128  ;;  %p497_p6 = scmp.lt.s32.totalorder %s19_s21, %s19_s21 }
   0xf   :  { %p493_p5 = scmp.ne.s32.totalorder %s19_s21, %s492_s27  ;;  %p498_p7 = scmp.lt.s32.totalorder %s492_s27, %s492_s27 }
  0x11   :  { %p499_p8 = por %p498_p7, %p497_p6 }
  0x13   :  { %p500_p9 = pnand %p499_p8, %p493_p5 }
  0x15   :  { %503 = shalt.err (!%p500_p9)
}
  0x16   :  { %24 = dma.hbm_to_vmem [thread:$0]  %s625_s0, 128, %s19_s21, [#allocation4], %s552_s23, %s552_s23, %s553_s24  }
  0x17   :  { %s554_s30 = smov [#allocation8]  }
  0x18   :  { %s44_s6 = sshll.u32 %s554_s30, 4  ;;  %s45_s6 = int_to_ptr.vmem [resolvable:$true] %s44_s6 }
  0x19   :  { %s512_s7 = scalar_lea.vmem %s45_s6, 1024  ;;  %p517_p11 = scmp.lt.s32.totalorder %s45_s6, %s45_s6 }
  0x1a   :  { %p513_p10 = scmp.ne.s32.totalorder %s45_s6, %s512_s7  ;;  %p518_p12 = scmp.lt.s32.totalorder %s512_s7, %s512_s7 }
  0x1c   :  { %p519_p13 = por %p518_p12, %p517_p11 }
  0x1e   :  { %p520_p0 = pnand %p519_p13, %p513_p10 }
  0x20   :  { %523 = shalt.err (!%p520_p0)
}
  0x21   :  { %50 = dma.hbm_to_vmem [thread:$0]  %s628_s3, 1024, %s45_s6, [#allocation7], %s552_s23, %s552_s23, %s553_s24  }
  0x22   :  { %544 = dma.done.wait [#allocation4], 128  }
  0x23   :  { %545 = vsyncadd [#allocation4], 4294967168 }
  0x24   :  { %546 = dma.done.wait [#allocation7], 2048  }
  0x25   :  { %547 = vsyncadd [#allocation7], 4294965248  ;;  %v555_v0 = vmov 0.0   ;;  %vm556_vm0 = vmmov 0   ;;  %v444_v1 = vld [vmem:[#allocation6 + $0x38] sm:$0xff]   ;;  %v445_v2 = vld [vmem:[#allocation6 + $0x30] sm:$0xff]   ;;  %v322_v46 = vlaneseq }
  0x26   :  { %396 = vmatprep.subr.bf16.mxu0 %v555_v0  ;;  %67 = vst [vmem:[#allocation2] sm:$0x3] %v555_v0  ;;  %412 = vmatprep.mubr.msk.bf16.mxu0 %vm556_vm0, %v555_v0  ;;  %v446_v3 = vld [vmem:[#allocation6 + $0x28] sm:$0xff]   ;;  %v375_v4 = vld [vmem:[#allocation3] sm:$0xff]   ;;  %v447_v8 = vld [vmem:[#allocation6 + $0x20] sm:$0xff]   ;;  %vm87_vm1 = vcmask 1041409  }
  0x27   :  { %416 = vmatprep.subr.bf16.mxu1 %v555_v0  ;;  %432 = vmatprep.mubr.msk.bf16.mxu1 %vm556_vm0, %v555_v0  ;;  %v376_v5 = vunpack.c.l.bf16 %v375_v4  ;;  %v377_v6 = vunpack.c.h.bf16 %v375_v4  ;;  %v452_v7 = vld [vmem:[#allocation8 + $0x38] sm:$0xff]   ;;  %v453_v11 = vld [vmem:[#allocation8 + $0x30] sm:$0xff]   ;;  %v454_v15 = vld [vmem:[#allocation8 + $0x28] sm:$0xff]   ;;  %v323_v47 = vand.u32 127, %v322_v46  ;;  %vm326_vm3 = vcmask 1041408  }
  0x28   :  { %397 = vmatpush3.bf16.msra.mxu0 %v444_v1  ;;  %417 = vmatpush3.bf16.msra.mxu1 %v452_v7  ;;  %v448_v14 = vld [vmem:[#allocation6 + $0x18] sm:$0xff]   ;;  %v449_v20 = vld [vmem:[#allocation6 + $0x10] sm:$0xff]   ;;  %v455_v23 = vld [vmem:[#allocation8 + $0x20] sm:$0xff]  }
  0x29   :  { %398 = vmatprep.subr.bf16.mxu0 %v555_v0  ;;  %v73_v9 = vrot.slane %v376_v5, 4  ;;  %v79_v10 = vrot.slane %v377_v6, 4  ;;  %418 = vmatprep.subr.bf16.mxu1 %v555_v0  ;;  %v450_v27 = vld [vmem:[#allocation6 + $0x8] sm:$0xff]   ;;  %v456_v29 = vld [vmem:[#allocation8 + $0x18] sm:$0xff]   ;;  %v451_v31 = vld [vmem:[#allocation6] sm:$0xff]   ;;  %vm324_vm2 = vcmp.lt.s32.totalorder %v323_v47, 4 }
  0x2a   :  { %v457_v32 = vld [vmem:[#allocation8 + $0x10] sm:$0xff]   ;;  %v458_v36 = vld [vmem:[#allocation8 + $0x8] sm:$0xff]   ;;  %v459_v37 = vld [vmem:[#allocation8] sm:$0xff]  }
  0x2b   :  { %v74_v12 = vadd.f32 %v376_v5, %v73_v9  ;;  %v80_v13 = vadd.f32 %v377_v6, %v79_v10  ;;  %v356_v38 = vld [vmem:[%s627_s2] ss:$0 sm:$0xff]  ;;  %s557_s2 = smov [#allocation9]  }
  0x2c   :  { %399 = vmatpush3.bf16.msra.mxu0 %v445_v2  ;;  %419 = vmatpush3.bf16.msra.mxu1 %v453_v11  ;;  %v365_v48 = vld [vmem:[%s629_s4] ss:$0 sm:$0xff]  ;;  %s346_s4 = sshll.u32 %s557_s2, 4  ;;  %s347_s4 = int_to_ptr.vmem [resolvable:$true] %s346_s4 }
  0x2d   :  { %400 = vmatprep.subr.bf16.mxu0 %v555_v0  ;;  %v75_v16 = vrot.slane %v74_v12, 2  ;;  %v81_v17 = vrot.slane %v80_v13, 2  ;;  %420 = vmatprep.subr.bf16.mxu1 %v555_v0  ;;  %v68_v24 = vld [vmem:[#allocation2] sm:$0x3]  ;;  %s524_s11 = scalar_lea.vmem %s347_s4, 32  ;;  %p529_p2 = scmp.lt.s32.totalorder %s347_s4, %s347_s4 }
  0x2e   :  { %p525_p1 = scmp.ne.s32.totalorder %s347_s4, %s524_s11  ;;  %p530_p3 = scmp.lt.s32.totalorder %s524_s11, %s524_s11 }
  0x2f   :  { %v76_v18 = vadd.f32 %v75_v16, %v74_v12  ;;  %v82_v19 = vadd.f32 %v81_v17, %v80_v13 }
  0x30   :  { %401 = vmatpush3.bf16.msra.mxu0 %v446_v3  ;;  %421 = vmatpush3.bf16.msra.mxu1 %v454_v15  ;;  %p531_p4 = por %p530_p3, %p529_p2 }
  0x31   :  { %402 = vmatprep.subr.bf16.mxu0 %v555_v0  ;;  %v77_v21 = vrot.slane %v76_v18, 1  ;;  %v83_v22 = vrot.slane %v82_v19, 1  ;;  %422 = vmatprep.subr.bf16.mxu1 %v555_v0 }
  0x32   :  { %p532_p5 = pnand %p531_p4, %p525_p1 }
  0x33   :  { %v78_v25 = vadd.f32 %v77_v21, %v76_v18  ;;  %v84_v26 = vadd.f32 %v83_v22, %v82_v19 }
  0x34   :  { %403 = vmatpush3.bf16.msra.mxu0 %v447_v8  ;;  %423 = vmatpush3.bf16.msra.mxu1 %v455_v23 }
  0x35   :  { %404 = vmatprep.subr.bf16.mxu0 %v555_v0  ;;  %v88_v28 = vsel %vm87_vm1, %v84_v26, %v78_v25  ;;  %424 = vmatprep.subr.bf16.mxu1 %v555_v0 }
  0x36   :  { %v90_v30 = vadd.f32 %v88_v28, %v68_v24 }
  0x38   :  { %405 = vmatpush3.bf16.msra.mxu0 %v448_v14  ;;  %91 = vst [vmem:[#allocation2] sm:$0x3] %v90_v30  ;;  %425 = vmatpush3.bf16.msra.mxu1 %v456_v29 }
  0x39   :  { %406 = vmatprep.subr.bf16.mxu0 %v555_v0  ;;  %426 = vmatprep.subr.bf16.mxu1 %v555_v0 }
  0x3c   :  { %407 = vmatpush3.bf16.msra.mxu0 %v449_v20  ;;  %427 = vmatpush3.bf16.msra.mxu1 %v457_v32 }
  0x3d   :  { %408 = vmatprep.subr.bf16.mxu0 %v555_v0  ;;  %428 = vmatprep.subr.bf16.mxu1 %v555_v0 }
  0x3f   :  { %v95_v33 = vld [vmem:[#allocation2] sm:$0x3] }
  0x40   :  { %409 = vmatpush3.bf16.msra.mxu0 %v450_v27  ;;  %v96_v34 = vmul.f32 0.125, %v95_v33  ;;  %429 = vmatpush3.bf16.msra.mxu1 %v458_v36 }
  0x41   :  { %410 = vmatprep.subr.bf16.mxu0 %v555_v0  ;;  %430 = vmatprep.subr.bf16.mxu1 %v555_v0 }
  0x42   :  { %v97_v35 = vpack.c.bf16 %v96_v34, %v96_v34 }
  0x44   :  { %411 = vmatpush3.bf16.msra.mxu0 %v451_v31  ;;  %431 = vmatpush3.bf16.msra.mxu1 %v459_v37 }
  0x47   :  { %413 = vmatmul.mubr.bf16.vlgmr.msra.gmra.mxu0 %v97_v35 }
 0x107   :  { %v203_v39 = vpop.f32.mrf.mxu0 }
 0x108   :  { %v204_v40 = vadd.f32 %v356_v38, %v203_v39 }
 0x109   :  { %v414_v41 = vpop.f32.mrf.mxu0 }
 0x10a   :  { %v209_v42 = vmax.f32 %v204_v40, 0.0 }
 0x10b   :  { %v206_v43 = vpop.f32.mrf.mxu0 }
 0x10c   :  { %v210_v44 = vpack.c.bf16 %v209_v42, %v209_v42 }
 0x10d   :  { %v415_v45 = vpop.f32.mrf.mxu0 }
 0x10e   :  { %433 = vmatmul.mubr.bf16.vlgmr.msra.gmra.mxu1 %v210_v44 }
 0x1ce   :  { %v316_v49 = vpop.f32.mrf.mxu1 }
 0x1cf   :  { %v317_v50 = vadd.f32 %v365_v48, %v316_v49 }
 0x1d0   :  { %v434_v51 = vpop.f32.mrf.mxu1 }
 0x1d1   :  { %v325_v52 = vsel %vm324_vm2, %v317_v50, -1e+30 }
 0x1d2   :  { %v319_v53 = vpop.f32.mrf.mxu1  ;;  %v327_v54 = vsel %vm326_vm3, %v325_v52, -inf }
 0x1d3   :  { %328 = vmax.xlane.f32.xlu0 %v327_v54 }
 0x1d4   :  { %v435_v55 = vpop.f32.mrf.mxu1 }
 0x25c   :  { %v329_v56 = vpop.xlane.xlu0 %328 }
 0x25d   :  { %v330_v57 = vsub.f32 %v325_v52, %v329_v56 }
 0x25f   :  { %v331_v58 = vmul.f32 1.442695, %v330_v57 }
 0x261   :  { %460 = vpow2.f32 %v331_v58 }
 0x26e   :  { %v461_v59 = vpop.eup %460 }
 0x26f   :  { %v333_v60 = vsel %vm326_vm3, %v461_v59, 0.0 }
 0x270   :  { %334 = vadd.xlane.f32.xlu0 %v333_v60 }
 0x2f9   :  { %v335_v61 = vpop.xlane.xlu0 %334 }
 0x2fa   :  { %462 = vlog2.f32 %v335_v61 }
 0x307   :  { %v463_v62 = vpop.eup %462 }
 0x308   :  { %v337_v63 = vmul.f32 0.6931472, %v463_v62 }
 0x30a   :  { %v338_v0 = vsub.f32 %v330_v57, %v337_v63 }
 0x30c   :  { %339 = vst [vmem:[#allocation9] sm:$0x3] %v338_v0 }
 0x30d   :  { %535 = shalt.err (!%p532_p5)
}
 0x30e   :  { %349 = dma.vmem_to_hbm [thread:$0]  %s347_s4, 32, %s630_s5, [#allocation5]  }
 0x30f   :  { %548 = dma.done.wait [#allocation5], 32  }
 0x310   :  { %549 = vsyncadd [#allocation5], 4294967264 }
 0x311   :  { %353 = vsyncpa [#allocation4], 1 }
 0x312   :  { %354 = vsyncpa [#allocation7], 1 }
 0x313   :  { %355 = vsyncpa [#allocation5], 1 }

</bundles_post_ra>
